<compile_context>
chip_gen: v5e
topology: v5e:2x2
jax: 0.10.0
libtpu: 0.0.40
codegen_flags: <defaults>
</compile_context>

<pallas_src>
import jax
import jax.numpy as jnp
from jax import lax
from jax.experimental import pallas as pl
from jax.experimental.pallas import tpu as pltpu

NEG_SLOPE = 0.01   # nn.LeakyReLU default
BN_EPS = 1e-5      # nn.BatchNorm1d default


def _leaky_relu(x):
    return jnp.where(x >= 0, x, NEG_SLOPE * x)


# -----------------------------------------------------------------------------
# Fused kernel: LSTM recurrence + BN(eval) + LeakyReLU + dense1 + dense2 +
# linear1, producing the final (bt, 1) prediction for one batch tile.
#
#   x_ref:    (T, bt, In)  time-major block of the input
#   wih_ref:  (In, 4H)     weight_ih_l0^T, gate order i, f, g, o
#   b_ref:    (1, 4H)      bias_ih + bias_hh
#   whhw_ref: (4H, 4H)     rows [3H:4H] = weight_hh_l0^T, other rows zero
#   bns/bnt:  (1, 4H)      LSTM-block BN scale/shift, nonzero only in [3H:4H]
#   w1_ref:   (4H, 2H)     rows [3H:4H] = dense1 W^T with BN folded, rest zero
#   b1_ref:   (1, 2H)      dense1 bias with BN folded
#   w2_ref:   (2H, H)      dense2 W^T with BN folded;  b2_ref: (1, H)
#   w3_ref:   (H, 1)       linear1 W^T;                b3_ref: (1, 1)
#   out_ref:  (bt, 1)
# -----------------------------------------------------------------------------
def fused_lstm_model_kernel(x_ref, wih_ref, b_ref, whhw_ref,
                            bns_ref, bnt_ref,
                            w1_ref, b1_ref, w2_ref, b2_ref, w3_ref, b3_ref,
                            out_ref):
    T, bt, _ = x_ref.shape
    H4 = wih_ref.shape[1]
    H = H4 // 4

    # Load every weight once (resident values for the whole tile).
    wih = wih_ref[...]
    whhw = whhw_ref[...]
    bns, bnt = bns_ref[...], bnt_ref[...]
    w1, b1 = w1_ref[...], b1_ref[...]
    w2, b2 = w2_ref[...], b2_ref[...]
    w3, b3 = w3_ref[...], b3_ref[...]

    # Strip-mine the batch so the recurrent state stays vreg-resident across
    # the unrolled T steps (64 rows -> 8+8 vregs for h/c).
    ck = 64 if bt % 64 == 0 else bt
    n_chunks = bt // ck

    bvec = jnp.broadcast_to(b_ref[...], (ck, H4))        # hoisted broadcast

    # Lane mask selecting the tanh gate (g) inside the 4H-wide tile (hoisted).
    lane = lax.broadcasted_iota(jnp.int32, (ck, H4), 1)
    is_g = (lane >= 2 * H) & (lane < 3 * H)

    for ci in range(n_chunks):                           # static
        r0 = ci * ck

        # ---- hoisted input path: x @ W_ih for every timestep of this chunk.
        # Independent of h (off the serial path); time-major layout makes each
        # load a contiguous, sublane-aligned (ck, In) block.
        xw = [jnp.dot(x_ref[t, r0:r0 + ck, :], wih,
                      preferred_element_type=jnp.float32) + bvec
              for t in range(T)]

        # 4H-wide recurrent state: c valid in lanes [H:2H] (aligned with f),
        # h valid in lanes [3H:4H] (aligned with o).  Other lanes carry
        # bounded junk annihilated by the zero rows of whhw / w1 and the zero
        # BN scale outside [3H:4H].
        h = jnp.zeros((ck, H4), jnp.float32)
        c = jnp.zeros((ck, H4), jnp.float32)

        # ---- recurrence: only h @ W_hh on the serial path, fully unrolled --
        for t in range(T):                               # static, T small
            gates = xw[t] + jnp.dot(h, whhw,
                                    preferred_element_type=jnp.float32)
            # One tanh for all four gates: sigmoid(x) = 0.5*(tanh(x/2)+1),
            # i.e. a single EUP op per element instead of tanh + exp + recip.
            z = jnp.where(is_g, gates, 0.5 * gates)
            tz = jnp.tanh(z)
            act = jnp.where(is_g, tz, 0.5 * (tz + 1.0))
            # i*g lands in lanes [0:H] and [2H:3H]; rolls (XLU slot) move the
            # products onto the c / h lanes.
            prod = act * pltpu.roll(act, shift=2 * H, axis=1)
            c = act * c + pltpu.roll(prod, shift=H, axis=1)         # f*c+i*g @ [H:2H]
            h = act * jnp.tanh(pltpu.roll(c, shift=2 * H, axis=1))  # o*tanh(c) @ [3H:4H]

        # ---- last timestep only: BN(eval)+LeakyReLU, then fused dense head -
        a = _leaky_relu(h * bns + bnt)        # exact zeros outside [3H:4H]
        y = _leaky_relu(jnp.dot(a, w1,
                                preferred_element_type=jnp.float32) + b1)
        y = _leaky_relu(jnp.dot(y, w2,
                                preferred_element_type=jnp.float32) + b2)
        out_ref[r0:r0 + ck, :] = jnp.dot(
            y, w3, preferred_element_type=jnp.float32) + b3


# -----------------------------------------------------------------------------
# Wrapper
# -----------------------------------------------------------------------------
def _pick_batch_tile(B):
    """Largest tile that divides B, capped at 256 rows, and capped at B//2
    once B >= 16 so the grid has >= 2 steps (keeps both v7x TensorCores busy;
    costs only one extra ~0.35 us grid step on v5e/v6e)."""
    cap = 256
    if B >= 16:
        cap = min(cap, max(8, (B // 2) // 8 * 8))
    for bt in (256, 128, 64, 32, 16, 8):
        if bt <= cap and B % bt == 0:
            return bt
    return B


@jax.jit
def lstm_model_forward(x, fp):
    B, T, In = x.shape
    bt = _pick_batch_tile(B)
    grid = (B // bt,)

    # Time-major so per-step reads inside the kernel are contiguous blocks.
    xt = jnp.transpose(x, (1, 0, 2))                    # (T, B, In)

    weights = (fp["wih"], fp["b"], fp["whh_w"], fp["bns_w"], fp["bnt_w"],
               fp["w1"], fp["b1"], fp["w2"], fp["b2"], fp["w3"], fp["b3"])

    in_specs = [pl.BlockSpec((T, bt, In), lambda i: (0, i, 0))]
    in_specs += [pl.BlockSpec(w.shape, lambda i: (0, 0)) for w in weights]

    H4 = fp["wih"].shape[1]
    # Rough VMEM budget: double-buffered x tile + weights + chunk
    # intermediates, with headroom; never above v7x's 64 MiB physical.
    # TODO(synk): on v5e/v6e, larger batch tiles (512-1024) + higher limit
    #             amortize per-step overhead further.
    est = 4 * (2 * T * bt * In
               + 2 * sum(int(w.size) for w in weights)
               + 12 * bt * H4)
    vmem_limit = int(min(64 * 1024 * 1024, max(32 * 1024 * 1024, 2 * est)))

    return pl.pallas_call(
        fused_lstm_model_kernel,
        out_shape=jax.ShapeDtypeStruct((B, 1), jnp.float32),
        grid=grid,
        in_specs=in_specs,
        out_specs=pl.BlockSpec((bt, 1), lambda i: (i, 0)),
        compiler_params=pltpu.CompilerParams(
            dimension_semantics=("parallel",),
            vmem_limit_bytes=vmem_limit),
    )(xt, *weights)


# -----------------------------------------------------------------------------
# Parameters (PyTorch-like raw params) + one-time eval-mode folding.
# -----------------------------------------------------------------------------
def _uniform(key, shape, bound):
    return jax.random.uniform(key, shape, jnp.float32, -bound, bound)


def _bn_params(n):
    # nn.BatchNorm1d defaults: weight=1, bias=0, running_mean=0, running_var=1
    return {"gamma": jnp.ones((1, n), jnp.float32),
            "beta": jnp.zeros((1, n), jnp.float32),
            "mean": jnp.zeros((1, n), jnp.float32),
            "var": jnp.ones((1, n), jnp.float32)}


def init_params(key, input_dim, hidden_dim):
    H = hidden_dim
    ks = jax.random.split(key, 10)
    kl = H ** -0.5
    k2 = (2 * H) ** -0.5
    return {
        "lstm": {
            "wih_t": _uniform(ks[0], (input_dim, 4 * H), kl),   # (In, 4H)
            "whh_t": _uniform(ks[1], (H, 4 * H), kl),           # (H, 4H)
            "bias": (_uniform(ks[2], (1, 4 * H), kl)
                     + _uniform(ks[3], (1, 4 * H), kl)),
            "bn": _bn_params(H),
        },
        "dense1": {"w_t": _uniform(ks[4], (H, 2 * H), kl),
                   "bias": _uniform(ks[5], (1, 2 * H), kl),
                   "bn": _bn_params(2 * H)},
        "dense2": {"w_t": _uniform(ks[6], (2 * H, H), k2),
                   "bias": _uniform(ks[7], (1, H), k2),
                   "bn": _bn_params(H)},
        "linear1": {"w_t": _uniform(ks[8], (H, 1), kl),
                    "bias": _uniform(ks[9], (1, 1), kl)},
    }


def fold_params(p):
    """Fold eval-mode BatchNorms into weights/biases and build the lane-dense
    (4H-wide) layouts the fused kernel expects.  Run once at parameter prep."""
    H = p["lstm"]["whh_t"].shape[0]
    H4 = 4 * H

    def bn_fold(bn):
        s = bn["gamma"] * lax.rsqrt(bn["var"] + BN_EPS)
        return s, bn["beta"] - bn["mean"] * s

    s0, t0 = bn_fold(p["lstm"]["bn"])                            # (1, H)
    bns_w = jnp.zeros((1, H4), jnp.float32).at[:, 3 * H:].set(s0)
    bnt_w = jnp.zeros((1, H4), jnp.float32).at[:, 3 * H:].set(t0)

    whh_w = jnp.zeros((H4, H4), jnp.float32).at[3 * H:, :].set(p["lstm"]["whh_t"])

    s1, t1 = bn_fold(p["dense1"]["bn"])                          # (1, 2H)
    w1f = p["dense1"]["w_t"] * s1
    b1f = p["dense1"]["bias"] * s1 + t1
    w1w = jnp.zeros((H4, 2 * H), jnp.float32).at[3 * H:, :].set(w1f)

    s2, t2 = bn_fold(p["dense2"]["bn"])                          # (1, H)
    w2f = p["dense2"]["w_t"] * s2
    b2f = p["dense2"]["bias"] * s2 + t2

    return {"wih": p["lstm"]["wih_t"], "b": p["lstm"]["bias"], "whh_w": whh_w,
            "bns_w": bns_w, "bnt_w": bnt_w,
            "w1": w1w, "b1": b1f, "w2": w2f, "b2": b2f,
            "w3": p["linear1"]["w_t"], "b3": p["linear1"]["bias"]}


# -----------------------------------------------------------------------------
# Pure-JAX eval-mode reference (for a numerical sanity check).
# -----------------------------------------------------------------------------
def reference_forward(x, p):
    B, T, _ = x.shape
    H = p["lstm"]["whh_t"].shape[0]
    hi = lax.Precision.HIGHEST

    def bn(v, b):
        return (v - b["mean"]) * lax.rsqrt(b["var"] + BN_EPS) * b["gamma"] + b["beta"]

    h = jnp.zeros((B, H), jnp.float32)
    c = jnp.zeros((B, H), jnp.float32)
    for t in range(T):
        g = (jnp.dot(x[:, t, :], p["lstm"]["wih_t"], precision=hi)
             + jnp.dot(h, p["lstm"]["whh_t"], precision=hi)
             + p["lstm"]["bias"])
        i = jax.nn.sigmoid(g[:, :H])
        f = jax.nn.sigmoid(g[:, H:2 * H])
        gg = jnp.tanh(g[:, 2 * H:3 * H])
        o = jax.nn.sigmoid(g[:, 3 * H:])
        c = f * c + i * gg
        h = o * jnp.tanh(c)
    # Eval-mode head is pointwise over (B, T); only t = T-1 reaches linear1.
    a = _leaky_relu(bn(h, p["lstm"]["bn"]))
    y = _leaky_relu(bn(jnp.dot(a, p["dense1"]["w_t"], precision=hi)
                       + p["dense1"]["bias"], p["dense1"]["bn"]))
    y = _leaky_relu(bn(jnp.dot(y, p["dense2"]["w_t"], precision=hi)
                       + p["dense2"]["bias"], p["dense2"]["bn"]))
    return jnp.dot(y, p["linear1"]["w_t"], precision=hi) + p["linear1"]["bias"]


if __name__ == "__main__":
    B, T, INPUT_DIM, HIDDEN_DIM = 2, 8, 4, 32

    key = jax.random.PRNGKey(0)
    key_x, key_p = jax.random.split(key)
    x = jax.random.normal(key_x, (B, T, INPUT_DIM), jnp.float32)
    params = init_params(key_p, INPUT_DIM, HIDDEN_DIM)
    folded = fold_params(params)

    y = lstm_model_forward(x, folded)
    jax.block_until_ready(y)
    assert y.shape == (B, 1), y.shape
    assert bool(jnp.all(jnp.isfinite(y)))

    y_ref = reference_forward(x, params)
    assert bool(jnp.allclose(y, y_ref, rtol=2e-2, atol=2e-2)), (y, y_ref)

    print("KERNEL_OK")
</pallas_src>

<mosaic_0001>
module attributes {stable_mosaic.version = 11 : i64} {
  func.func @fused_lstm_model_kernel(%arg0: i32, %arg1: memref<8x2x4xf32, #tpu.memory_space<vmem>>, %arg2: memref<4x128xf32, #tpu.memory_space<vmem>>, %arg3: memref<1x128xf32, #tpu.memory_space<vmem>>, %arg4: memref<128x128xf32, #tpu.memory_space<vmem>>, %arg5: memref<1x128xf32, #tpu.memory_space<vmem>>, %arg6: memref<1x128xf32, #tpu.memory_space<vmem>>, %arg7: memref<128x64xf32, #tpu.memory_space<vmem>>, %arg8: memref<1x64xf32, #tpu.memory_space<vmem>>, %arg9: memref<64x32xf32, #tpu.memory_space<vmem>>, %arg10: memref<1x32xf32, #tpu.memory_space<vmem>>, %arg11: memref<32x1xf32, #tpu.memory_space<vmem>>, %arg12: memref<1x1xf32, #tpu.memory_space<vmem>>, %arg13: memref<2x1xf32, #tpu.memory_space<vmem>>) attributes {dimension_semantics = [#tpu.dimension_semantics<parallel>], iteration_bounds = array<i64: 1>, scalar_prefetch = 0 : i64, scratch_operands = 0 : i64, tpu.core_type = #tpu.core_type<tc>, window_params = [{transform_indices = @transform_0, window_bounds = array<i64: 8, 2, 4>}, {pipeline_mode = #tpu.pipeline_mode<synchronous>, transform_indices = @transform_1, window_bounds = array<i64: 4, 128>}, {pipeline_mode = #tpu.pipeline_mode<synchronous>, transform_indices = @transform_2, window_bounds = array<i64: 1, 128>}, {pipeline_mode = #tpu.pipeline_mode<synchronous>, transform_indices = @transform_3, window_bounds = array<i64: 128, 128>}, {pipeline_mode = #tpu.pipeline_mode<synchronous>, transform_indices = @transform_4, window_bounds = array<i64: 1, 128>}, {pipeline_mode = #tpu.pipeline_mode<synchronous>, transform_indices = @transform_5, window_bounds = array<i64: 1, 128>}, {pipeline_mode = #tpu.pipeline_mode<synchronous>, transform_indices = @transform_6, window_bounds = array<i64: 128, 64>}, {pipeline_mode = #tpu.pipeline_mode<synchronous>, transform_indices = @transform_7, window_bounds = array<i64: 1, 64>}, {pipeline_mode = #tpu.pipeline_mode<synchronous>, transform_indices = @transform_8, window_bounds = array<i64: 64, 32>}, {pipeline_mode = #tpu.pipeline_mode<synchronous>, transform_indices = @transform_9, window_bounds = array<i64: 1, 32>}, {pipeline_mode = #tpu.pipeline_mode<synchronous>, transform_indices = @transform_10, window_bounds = array<i64: 32, 1>}, {pipeline_mode = #tpu.pipeline_mode<synchronous>, transform_indices = @transform_11, window_bounds = array<i64: 1, 1>}, {transform_indices = @transform_12, window_bounds = array<i64: 2, 1>}]} {
    %c0 = arith.constant 0 : index
    %c0_0 = arith.constant 0 : index
    %0 = vector.load %arg2[%c0, %c0_0] : memref<4x128xf32, #tpu.memory_space<vmem>>, vector<4x128xf32>
    %c0_1 = arith.constant 0 : index
    %c0_2 = arith.constant 0 : index
    %1 = vector.load %arg4[%c0_1, %c0_2] : memref<128x128xf32, #tpu.memory_space<vmem>>, vector<128x128xf32>
    %c0_3 = arith.constant 0 : index
    %c0_4 = arith.constant 0 : index
    %2 = vector.load %arg5[%c0_3, %c0_4] : memref<1x128xf32, #tpu.memory_space<vmem>>, vector<1x128xf32>
    %c0_5 = arith.constant 0 : index
    %c0_6 = arith.constant 0 : index
    %3 = vector.load %arg6[%c0_5, %c0_6] : memref<1x128xf32, #tpu.memory_space<vmem>>, vector<1x128xf32>
    %c0_7 = arith.constant 0 : index
    %c0_8 = arith.constant 0 : index
    %4 = vector.load %arg7[%c0_7, %c0_8] : memref<128x64xf32, #tpu.memory_space<vmem>>, vector<128x64xf32>
    %c0_9 = arith.constant 0 : index
    %c0_10 = arith.constant 0 : index
    %5 = vector.load %arg8[%c0_9, %c0_10] : memref<1x64xf32, #tpu.memory_space<vmem>>, vector<1x64xf32>
    %c0_11 = arith.constant 0 : index
    %c0_12 = arith.constant 0 : index
    %6 = vector.load %arg9[%c0_11, %c0_12] : memref<64x32xf32, #tpu.memory_space<vmem>>, vector<64x32xf32>
    %c0_13 = arith.constant 0 : index
    %c0_14 = arith.constant 0 : index
    %7 = vector.load %arg10[%c0_13, %c0_14] : memref<1x32xf32, #tpu.memory_space<vmem>>, vector<1x32xf32>
    %c0_15 = arith.constant 0 : index
    %c0_16 = arith.constant 0 : index
    %8 = vector.load %arg11[%c0_15, %c0_16] : memref<32x1xf32, #tpu.memory_space<vmem>>, vector<32x1xf32>
    %c0_17 = arith.constant 0 : index
    %c0_18 = arith.constant 0 : index
    %9 = vector.load %arg12[%c0_17, %c0_18] : memref<1x1xf32, #tpu.memory_space<vmem>>, vector<1x1xf32>
    %c0_19 = arith.constant 0 : index
    %c0_20 = arith.constant 0 : index
    %10 = vector.load %arg3[%c0_19, %c0_20] : memref<1x128xf32, #tpu.memory_space<vmem>>, vector<1x128xf32>
    %11 = vector.shape_cast %10 : vector<1x128xf32> to vector<1x128xf32>
    %12 = vector.broadcast %11 : vector<1x128xf32> to vector<2x128xf32>
    %13 = tpu.iota {dimensions = array<i32: 1>} : vector<2x128xi32>
    %c64_i32 = arith.constant 64 : i32
    %14 = vector.broadcast %c64_i32 : i32 to vector<2x128xi32>
    %15 = arith.cmpi sge, %13, %14 : vector<2x128xi32>
    %c96_i32 = arith.constant 96 : i32
    %16 = vector.broadcast %c96_i32 : i32 to vector<2x128xi32>
    %17 = arith.cmpi slt, %13, %16 : vector<2x128xi32>
    %18 = arith.andi %15, %17 : vector<2x128xi1>
    %c0_21 = arith.constant 0 : index
    %c0_22 = arith.constant 0 : index
    %c0_23 = arith.constant 0 : index
    %19 = vector.load %arg1[%c0_21, %c0_22, %c0_23] : memref<8x2x4xf32, #tpu.memory_space<vmem>>, vector<1x2x4xf32>
    %20 = vector.shape_cast %19 : vector<1x2x4xf32> to vector<2x4xf32>
    %cst = arith.constant dense<0.000000e+00> : vector<2x128xf32>
    %21 = tpu.matmul %20, %0, %cst {dimension_numbers = #tpu.dot_dimension_numbers<[1], [0], [0], [1], [0, 0, 1, 1], [], []>} : vector<2x4xf32>, vector<4x128xf32>, vector<2x128xf32> -> vector<2x128xf32>
    %22 = arith.addf %21, %12 : vector<2x128xf32>
    %c1 = arith.constant 1 : index
    %c0_24 = arith.constant 0 : index
    %c0_25 = arith.constant 0 : index
    %23 = vector.load %arg1[%c1, %c0_24, %c0_25] : memref<8x2x4xf32, #tpu.memory_space<vmem>>, vector<1x2x4xf32>
    %24 = vector.shape_cast %23 : vector<1x2x4xf32> to vector<2x4xf32>
    %cst_26 = arith.constant dense<0.000000e+00> : vector<2x128xf32>
    %25 = tpu.matmul %24, %0, %cst_26 {dimension_numbers = #tpu.dot_dimension_numbers<[1], [0], [0], [1], [0, 0, 1, 1], [], []>} : vector<2x4xf32>, vector<4x128xf32>, vector<2x128xf32> -> vector<2x128xf32>
    %26 = arith.addf %25, %12 : vector<2x128xf32>
    %c2 = arith.constant 2 : index
    %c0_27 = arith.constant 0 : index
    %c0_28 = arith.constant 0 : index
    %27 = vector.load %arg1[%c2, %c0_27, %c0_28] : memref<8x2x4xf32, #tpu.memory_space<vmem>>, vector<1x2x4xf32>
    %28 = vector.shape_cast %27 : vector<1x2x4xf32> to vector<2x4xf32>
    %cst_29 = arith.constant dense<0.000000e+00> : vector<2x128xf32>
    %29 = tpu.matmul %28, %0, %cst_29 {dimension_numbers = #tpu.dot_dimension_numbers<[1], [0], [0], [1], [0, 0, 1, 1], [], []>} : vector<2x4xf32>, vector<4x128xf32>, vector<2x128xf32> -> vector<2x128xf32>
    %30 = arith.addf %29, %12 : vector<2x128xf32>
    %c3 = arith.constant 3 : index
    %c0_30 = arith.constant 0 : index
    %c0_31 = arith.constant 0 : index
    %31 = vector.load %arg1[%c3, %c0_30, %c0_31] : memref<8x2x4xf32, #tpu.memory_space<vmem>>, vector<1x2x4xf32>
    %32 = vector.shape_cast %31 : vector<1x2x4xf32> to vector<2x4xf32>
    %cst_32 = arith.constant dense<0.000000e+00> : vector<2x128xf32>
    %33 = tpu.matmul %32, %0, %cst_32 {dimension_numbers = #tpu.dot_dimension_numbers<[1], [0], [0], [1], [0, 0, 1, 1], [], []>} : vector<2x4xf32>, vector<4x128xf32>, vector<2x128xf32> -> vector<2x128xf32>
    %34 = arith.addf %33, %12 : vector<2x128xf32>
    %c4 = arith.constant 4 : index
    %c0_33 = arith.constant 0 : index
    %c0_34 = arith.constant 0 : index
    %35 = vector.load %arg1[%c4, %c0_33, %c0_34] : memref<8x2x4xf32, #tpu.memory_space<vmem>>, vector<1x2x4xf32>
    %36 = vector.shape_cast %35 : vector<1x2x4xf32> to vector<2x4xf32>
    %cst_35 = arith.constant dense<0.000000e+00> : vector<2x128xf32>
    %37 = tpu.matmul %36, %0, %cst_35 {dimension_numbers = #tpu.dot_dimension_numbers<[1], [0], [0], [1], [0, 0, 1, 1], [], []>} : vector<2x4xf32>, vector<4x128xf32>, vector<2x128xf32> -> vector<2x128xf32>
    %38 = arith.addf %37, %12 : vector<2x128xf32>
    %c5 = arith.constant 5 : index
    %c0_36 = arith.constant 0 : index
    %c0_37 = arith.constant 0 : index
    %39 = vector.load %arg1[%c5, %c0_36, %c0_37] : memref<8x2x4xf32, #tpu.memory_space<vmem>>, vector<1x2x4xf32>
    %40 = vector.shape_cast %39 : vector<1x2x4xf32> to vector<2x4xf32>
    %cst_38 = arith.constant dense<0.000000e+00> : vector<2x128xf32>
    %41 = tpu.matmul %40, %0, %cst_38 {dimension_numbers = #tpu.dot_dimension_numbers<[1], [0], [0], [1], [0, 0, 1, 1], [], []>} : vector<2x4xf32>, vector<4x128xf32>, vector<2x128xf32> -> vector<2x128xf32>
    %42 = arith.addf %41, %12 : vector<2x128xf32>
    %c6 = arith.constant 6 : index
    %c0_39 = arith.constant 0 : index
    %c0_40 = arith.constant 0 : index
    %43 = vector.load %arg1[%c6, %c0_39, %c0_40] : memref<8x2x4xf32, #tpu.memory_space<vmem>>, vector<1x2x4xf32>
    %44 = vector.shape_cast %43 : vector<1x2x4xf32> to vector<2x4xf32>
    %cst_41 = arith.constant dense<0.000000e+00> : vector<2x128xf32>
    %45 = tpu.matmul %44, %0, %cst_41 {dimension_numbers = #tpu.dot_dimension_numbers<[1], [0], [0], [1], [0, 0, 1, 1], [], []>} : vector<2x4xf32>, vector<4x128xf32>, vector<2x128xf32> -> vector<2x128xf32>
    %46 = arith.addf %45, %12 : vector<2x128xf32>
    %c7 = arith.constant 7 : index
    %c0_42 = arith.constant 0 : index
    %c0_43 = arith.constant 0 : index
    %47 = vector.load %arg1[%c7, %c0_42, %c0_43] : memref<8x2x4xf32, #tpu.memory_space<vmem>>, vector<1x2x4xf32>
    %48 = vector.shape_cast %47 : vector<1x2x4xf32> to vector<2x4xf32>
    %cst_44 = arith.constant dense<0.000000e+00> : vector<2x128xf32>
    %49 = tpu.matmul %48, %0, %cst_44 {dimension_numbers = #tpu.dot_dimension_numbers<[1], [0], [0], [1], [0, 0, 1, 1], [], []>} : vector<2x4xf32>, vector<4x128xf32>, vector<2x128xf32> -> vector<2x128xf32>
    %50 = arith.addf %49, %12 : vector<2x128xf32>
    %cst_45 = arith.constant 0.000000e+00 : f32
    %51 = vector.broadcast %cst_45 : f32 to vector<2x128xf32>
    %cst_46 = arith.constant 0.000000e+00 : f32
    %52 = vector.broadcast %cst_46 : f32 to vector<2x128xf32>
    %cst_47 = arith.constant dense<0.000000e+00> : vector<2x128xf32>
    %53 = tpu.matmul %51, %1, %cst_47 {dimension_numbers = #tpu.dot_dimension_numbers<[1], [0], [0], [1], [0, 0, 1, 1], [], []>} : vector<2x128xf32>, vector<128x128xf32>, vector<2x128xf32> -> vector<2x128xf32>
    %54 = arith.addf %22, %53 : vector<2x128xf32>
    %cst_48 = arith.constant 5.000000e-01 : f32
    %55 = vector.broadcast %cst_48 : f32 to vector<2x128xf32>
    %56 = arith.mulf %55, %54 : vector<2x128xf32>
    %57 = arith.select %18, %54, %56 : vector<2x128xi1>, vector<2x128xf32>
    %58 = math.tanh %57 : vector<2x128xf32>
    %cst_49 = arith.constant 1.000000e+00 : f32
    %59 = vector.broadcast %cst_49 : f32 to vector<2x128xf32>
    %60 = arith.addf %58, %59 : vector<2x128xf32>
    %cst_50 = arith.constant 5.000000e-01 : f32
    %61 = vector.broadcast %cst_50 : f32 to vector<2x128xf32>
    %62 = arith.mulf %61, %60 : vector<2x128xf32>
    %63 = arith.select %18, %58, %62 : vector<2x128xi1>, vector<2x128xf32>
    %c64_i32_51 = arith.constant 64 : i32
    %64 = tpu.dynamic_rotate %63 by %c64_i32_51 dim 1 : vector<2x128xf32>, i32 -> vector<2x128xf32>
    %65 = arith.mulf %63, %64 : vector<2x128xf32>
    %66 = arith.mulf %63, %52 : vector<2x128xf32>
    %c32_i32 = arith.constant 32 : i32
    %67 = tpu.dynamic_rotate %65 by %c32_i32 dim 1 : vector<2x128xf32>, i32 -> vector<2x128xf32>
    %68 = arith.addf %66, %67 : vector<2x128xf32>
    %c64_i32_52 = arith.constant 64 : i32
    %69 = tpu.dynamic_rotate %68 by %c64_i32_52 dim 1 : vector<2x128xf32>, i32 -> vector<2x128xf32>
    %70 = math.tanh %69 : vector<2x128xf32>
    %71 = arith.mulf %63, %70 : vector<2x128xf32>
    %cst_53 = arith.constant dense<0.000000e+00> : vector<2x128xf32>
    %72 = tpu.matmul %71, %1, %cst_53 {dimension_numbers = #tpu.dot_dimension_numbers<[1], [0], [0], [1], [0, 0, 1, 1], [], []>} : vector<2x128xf32>, vector<128x128xf32>, vector<2x128xf32> -> vector<2x128xf32>
    %73 = arith.addf %26, %72 : vector<2x128xf32>
    %cst_54 = arith.constant 5.000000e-01 : f32
    %74 = vector.broadcast %cst_54 : f32 to vector<2x128xf32>
    %75 = arith.mulf %74, %73 : vector<2x128xf32>
    %76 = arith.select %18, %73, %75 : vector<2x128xi1>, vector<2x128xf32>
    %77 = math.tanh %76 : vector<2x128xf32>
    %cst_55 = arith.constant 1.000000e+00 : f32
    %78 = vector.broadcast %cst_55 : f32 to vector<2x128xf32>
    %79 = arith.addf %77, %78 : vector<2x128xf32>
    %cst_56 = arith.constant 5.000000e-01 : f32
    %80 = vector.broadcast %cst_56 : f32 to vector<2x128xf32>
    %81 = arith.mulf %80, %79 : vector<2x128xf32>
    %82 = arith.select %18, %77, %81 : vector<2x128xi1>, vector<2x128xf32>
    %c64_i32_57 = arith.constant 64 : i32
    %83 = tpu.dynamic_rotate %82 by %c64_i32_57 dim 1 : vector<2x128xf32>, i32 -> vector<2x128xf32>
    %84 = arith.mulf %82, %83 : vector<2x128xf32>
    %85 = arith.mulf %82, %68 : vector<2x128xf32>
    %c32_i32_58 = arith.constant 32 : i32
    %86 = tpu.dynamic_rotate %84 by %c32_i32_58 dim 1 : vector<2x128xf32>, i32 -> vector<2x128xf32>
    %87 = arith.addf %85, %86 : vector<2x128xf32>
    %c64_i32_59 = arith.constant 64 : i32
    %88 = tpu.dynamic_rotate %87 by %c64_i32_59 dim 1 : vector<2x128xf32>, i32 -> vector<2x128xf32>
    %89 = math.tanh %88 : vector<2x128xf32>
    %90 = arith.mulf %82, %89 : vector<2x128xf32>
    %cst_60 = arith.constant dense<0.000000e+00> : vector<2x128xf32>
    %91 = tpu.matmul %90, %1, %cst_60 {dimension_numbers = #tpu.dot_dimension_numbers<[1], [0], [0], [1], [0, 0, 1, 1], [], []>} : vector<2x128xf32>, vector<128x128xf32>, vector<2x128xf32> -> vector<2x128xf32>
    %92 = arith.addf %30, %91 : vector<2x128xf32>
    %cst_61 = arith.constant 5.000000e-01 : f32
    %93 = vector.broadcast %cst_61 : f32 to vector<2x128xf32>
    %94 = arith.mulf %93, %92 : vector<2x128xf32>
    %95 = arith.select %18, %92, %94 : vector<2x128xi1>, vector<2x128xf32>
    %96 = math.tanh %95 : vector<2x128xf32>
    %cst_62 = arith.constant 1.000000e+00 : f32
    %97 = vector.broadcast %cst_62 : f32 to vector<2x128xf32>
    %98 = arith.addf %96, %97 : vector<2x128xf32>
    %cst_63 = arith.constant 5.000000e-01 : f32
    %99 = vector.broadcast %cst_63 : f32 to vector<2x128xf32>
    %100 = arith.mulf %99, %98 : vector<2x128xf32>
    %101 = arith.select %18, %96, %100 : vector<2x128xi1>, vector<2x128xf32>
    %c64_i32_64 = arith.constant 64 : i32
    %102 = tpu.dynamic_rotate %101 by %c64_i32_64 dim 1 : vector<2x128xf32>, i32 -> vector<2x128xf32>
    %103 = arith.mulf %101, %102 : vector<2x128xf32>
    %104 = arith.mulf %101, %87 : vector<2x128xf32>
    %c32_i32_65 = arith.constant 32 : i32
    %105 = tpu.dynamic_rotate %103 by %c32_i32_65 dim 1 : vector<2x128xf32>, i32 -> vector<2x128xf32>
    %106 = arith.addf %104, %105 : vector<2x128xf32>
    %c64_i32_66 = arith.constant 64 : i32
    %107 = tpu.dynamic_rotate %106 by %c64_i32_66 dim 1 : vector<2x128xf32>, i32 -> vector<2x128xf32>
    %108 = math.tanh %107 : vector<2x128xf32>
    %109 = arith.mulf %101, %108 : vector<2x128xf32>
    %cst_67 = arith.constant dense<0.000000e+00> : vector<2x128xf32>
    %110 = tpu.matmul %109, %1, %cst_67 {dimension_numbers = #tpu.dot_dimension_numbers<[1], [0], [0], [1], [0, 0, 1, 1], [], []>} : vector<2x128xf32>, vector<128x128xf32>, vector<2x128xf32> -> vector<2x128xf32>
    %111 = arith.addf %34, %110 : vector<2x128xf32>
    %cst_68 = arith.constant 5.000000e-01 : f32
    %112 = vector.broadcast %cst_68 : f32 to vector<2x128xf32>
    %113 = arith.mulf %112, %111 : vector<2x128xf32>
    %114 = arith.select %18, %111, %113 : vector<2x128xi1>, vector<2x128xf32>
    %115 = math.tanh %114 : vector<2x128xf32>
    %cst_69 = arith.constant 1.000000e+00 : f32
    %116 = vector.broadcast %cst_69 : f32 to vector<2x128xf32>
    %117 = arith.addf %115, %116 : vector<2x128xf32>
    %cst_70 = arith.constant 5.000000e-01 : f32
    %118 = vector.broadcast %cst_70 : f32 to vector<2x128xf32>
    %119 = arith.mulf %118, %117 : vector<2x128xf32>
    %120 = arith.select %18, %115, %119 : vector<2x128xi1>, vector<2x128xf32>
    %c64_i32_71 = arith.constant 64 : i32
    %121 = tpu.dynamic_rotate %120 by %c64_i32_71 dim 1 : vector<2x128xf32>, i32 -> vector<2x128xf32>
    %122 = arith.mulf %120, %121 : vector<2x128xf32>
    %123 = arith.mulf %120, %106 : vector<2x128xf32>
    %c32_i32_72 = arith.constant 32 : i32
    %124 = tpu.dynamic_rotate %122 by %c32_i32_72 dim 1 : vector<2x128xf32>, i32 -> vector<2x128xf32>
    %125 = arith.addf %123, %124 : vector<2x128xf32>
    %c64_i32_73 = arith.constant 64 : i32
    %126 = tpu.dynamic_rotate %125 by %c64_i32_73 dim 1 : vector<2x128xf32>, i32 -> vector<2x128xf32>
    %127 = math.tanh %126 : vector<2x128xf32>
    %128 = arith.mulf %120, %127 : vector<2x128xf32>
    %cst_74 = arith.constant dense<0.000000e+00> : vector<2x128xf32>
    %129 = tpu.matmul %128, %1, %cst_74 {dimension_numbers = #tpu.dot_dimension_numbers<[1], [0], [0], [1], [0, 0, 1, 1], [], []>} : vector<2x128xf32>, vector<128x128xf32>, vector<2x128xf32> -> vector<2x128xf32>
    %130 = arith.addf %38, %129 : vector<2x128xf32>
    %cst_75 = arith.constant 5.000000e-01 : f32
    %131 = vector.broadcast %cst_75 : f32 to vector<2x128xf32>
    %132 = arith.mulf %131, %130 : vector<2x128xf32>
    %133 = arith.select %18, %130, %132 : vector<2x128xi1>, vector<2x128xf32>
    %134 = math.tanh %133 : vector<2x128xf32>
    %cst_76 = arith.constant 1.000000e+00 : f32
    %135 = vector.broadcast %cst_76 : f32 to vector<2x128xf32>
    %136 = arith.addf %134, %135 : vector<2x128xf32>
    %cst_77 = arith.constant 5.000000e-01 : f32
    %137 = vector.broadcast %cst_77 : f32 to vector<2x128xf32>
    %138 = arith.mulf %137, %136 : vector<2x128xf32>
    %139 = arith.select %18, %134, %138 : vector<2x128xi1>, vector<2x128xf32>
    %c64_i32_78 = arith.constant 64 : i32
    %140 = tpu.dynamic_rotate %139 by %c64_i32_78 dim 1 : vector<2x128xf32>, i32 -> vector<2x128xf32>
    %141 = arith.mulf %139, %140 : vector<2x128xf32>
    %142 = arith.mulf %139, %125 : vector<2x128xf32>
    %c32_i32_79 = arith.constant 32 : i32
    %143 = tpu.dynamic_rotate %141 by %c32_i32_79 dim 1 : vector<2x128xf32>, i32 -> vector<2x128xf32>
    %144 = arith.addf %142, %143 : vector<2x128xf32>
    %c64_i32_80 = arith.constant 64 : i32
    %145 = tpu.dynamic_rotate %144 by %c64_i32_80 dim 1 : vector<2x128xf32>, i32 -> vector<2x128xf32>
    %146 = math.tanh %145 : vector<2x128xf32>
    %147 = arith.mulf %139, %146 : vector<2x128xf32>
    %cst_81 = arith.constant dense<0.000000e+00> : vector<2x128xf32>
    %148 = tpu.matmul %147, %1, %cst_81 {dimension_numbers = #tpu.dot_dimension_numbers<[1], [0], [0], [1], [0, 0, 1, 1], [], []>} : vector<2x128xf32>, vector<128x128xf32>, vector<2x128xf32> -> vector<2x128xf32>
    %149 = arith.addf %42, %148 : vector<2x128xf32>
    %cst_82 = arith.constant 5.000000e-01 : f32
    %150 = vector.broadcast %cst_82 : f32 to vector<2x128xf32>
    %151 = arith.mulf %150, %149 : vector<2x128xf32>
    %152 = arith.select %18, %149, %151 : vector<2x128xi1>, vector<2x128xf32>
    %153 = math.tanh %152 : vector<2x128xf32>
    %cst_83 = arith.constant 1.000000e+00 : f32
    %154 = vector.broadcast %cst_83 : f32 to vector<2x128xf32>
    %155 = arith.addf %153, %154 : vector<2x128xf32>
    %cst_84 = arith.constant 5.000000e-01 : f32
    %156 = vector.broadcast %cst_84 : f32 to vector<2x128xf32>
    %157 = arith.mulf %156, %155 : vector<2x128xf32>
    %158 = arith.select %18, %153, %157 : vector<2x128xi1>, vector<2x128xf32>
    %c64_i32_85 = arith.constant 64 : i32
    %159 = tpu.dynamic_rotate %158 by %c64_i32_85 dim 1 : vector<2x128xf32>, i32 -> vector<2x128xf32>
    %160 = arith.mulf %158, %159 : vector<2x128xf32>
    %161 = arith.mulf %158, %144 : vector<2x128xf32>
    %c32_i32_86 = arith.constant 32 : i32
    %162 = tpu.dynamic_rotate %160 by %c32_i32_86 dim 1 : vector<2x128xf32>, i32 -> vector<2x128xf32>
    %163 = arith.addf %161, %162 : vector<2x128xf32>
    %c64_i32_87 = arith.constant 64 : i32
    %164 = tpu.dynamic_rotate %163 by %c64_i32_87 dim 1 : vector<2x128xf32>, i32 -> vector<2x128xf32>
    %165 = math.tanh %164 : vector<2x128xf32>
    %166 = arith.mulf %158, %165 : vector<2x128xf32>
    %cst_88 = arith.constant dense<0.000000e+00> : vector<2x128xf32>
    %167 = tpu.matmul %166, %1, %cst_88 {dimension_numbers = #tpu.dot_dimension_numbers<[1], [0], [0], [1], [0, 0, 1, 1], [], []>} : vector<2x128xf32>, vector<128x128xf32>, vector<2x128xf32> -> vector<2x128xf32>
    %168 = arith.addf %46, %167 : vector<2x128xf32>
    %cst_89 = arith.constant 5.000000e-01 : f32
    %169 = vector.broadcast %cst_89 : f32 to vector<2x128xf32>
    %170 = arith.mulf %169, %168 : vector<2x128xf32>
    %171 = arith.select %18, %168, %170 : vector<2x128xi1>, vector<2x128xf32>
    %172 = math.tanh %171 : vector<2x128xf32>
    %cst_90 = arith.constant 1.000000e+00 : f32
    %173 = vector.broadcast %cst_90 : f32 to vector<2x128xf32>
    %174 = arith.addf %172, %173 : vector<2x128xf32>
    %cst_91 = arith.constant 5.000000e-01 : f32
    %175 = vector.broadcast %cst_91 : f32 to vector<2x128xf32>
    %176 = arith.mulf %175, %174 : vector<2x128xf32>
    %177 = arith.select %18, %172, %176 : vector<2x128xi1>, vector<2x128xf32>
    %c64_i32_92 = arith.constant 64 : i32
    %178 = tpu.dynamic_rotate %177 by %c64_i32_92 dim 1 : vector<2x128xf32>, i32 -> vector<2x128xf32>
    %179 = arith.mulf %177, %178 : vector<2x128xf32>
    %180 = arith.mulf %177, %163 : vector<2x128xf32>
    %c32_i32_93 = arith.constant 32 : i32
    %181 = tpu.dynamic_rotate %179 by %c32_i32_93 dim 1 : vector<2x128xf32>, i32 -> vector<2x128xf32>
    %182 = arith.addf %180, %181 : vector<2x128xf32>
    %c64_i32_94 = arith.constant 64 : i32
    %183 = tpu.dynamic_rotate %182 by %c64_i32_94 dim 1 : vector<2x128xf32>, i32 -> vector<2x128xf32>
    %184 = math.tanh %183 : vector<2x128xf32>
    %185 = arith.mulf %177, %184 : vector<2x128xf32>
    %cst_95 = arith.constant dense<0.000000e+00> : vector<2x128xf32>
    %186 = tpu.matmul %185, %1, %cst_95 {dimension_numbers = #tpu.dot_dimension_numbers<[1], [0], [0], [1], [0, 0, 1, 1], [], []>} : vector<2x128xf32>, vector<128x128xf32>, vector<2x128xf32> -> vector<2x128xf32>
    %187 = arith.addf %50, %186 : vector<2x128xf32>
    %cst_96 = arith.constant 5.000000e-01 : f32
    %188 = vector.broadcast %cst_96 : f32 to vector<2x128xf32>
    %189 = arith.mulf %188, %187 : vector<2x128xf32>
    %190 = arith.select %18, %187, %189 : vector<2x128xi1>, vector<2x128xf32>
    %191 = math.tanh %190 : vector<2x128xf32>
    %cst_97 = arith.constant 1.000000e+00 : f32
    %192 = vector.broadcast %cst_97 : f32 to vector<2x128xf32>
    %193 = arith.addf %191, %192 : vector<2x128xf32>
    %cst_98 = arith.constant 5.000000e-01 : f32
    %194 = vector.broadcast %cst_98 : f32 to vector<2x128xf32>
    %195 = arith.mulf %194, %193 : vector<2x128xf32>
    %196 = arith.select %18, %191, %195 : vector<2x128xi1>, vector<2x128xf32>
    %c64_i32_99 = arith.constant 64 : i32
    %197 = tpu.dynamic_rotate %196 by %c64_i32_99 dim 1 : vector<2x128xf32>, i32 -> vector<2x128xf32>
    %198 = arith.mulf %196, %197 : vector<2x128xf32>
    %199 = arith.mulf %196, %182 : vector<2x128xf32>
    %c32_i32_100 = arith.constant 32 : i32
    %200 = tpu.dynamic_rotate %198 by %c32_i32_100 dim 1 : vector<2x128xf32>, i32 -> vector<2x128xf32>
    %201 = arith.addf %199, %200 : vector<2x128xf32>
    %c64_i32_101 = arith.constant 64 : i32
    %202 = tpu.dynamic_rotate %201 by %c64_i32_101 dim 1 : vector<2x128xf32>, i32 -> vector<2x128xf32>
    %203 = math.tanh %202 : vector<2x128xf32>
    %204 = arith.mulf %196, %203 : vector<2x128xf32>
    %205 = vector.broadcast %2 : vector<1x128xf32> to vector<2x128xf32>
    %206 = arith.mulf %204, %205 : vector<2x128xf32>
    %207 = vector.broadcast %3 : vector<1x128xf32> to vector<2x128xf32>
    %208 = arith.addf %206, %207 : vector<2x128xf32>
    %cst_102 = arith.constant 0.000000e+00 : f32
    %209 = vector.broadcast %cst_102 : f32 to vector<2x128xf32>
    %210 = arith.cmpf oge, %208, %209 : vector<2x128xf32>
    %cst_103 = arith.constant 0.00999999977 : f32
    %211 = vector.broadcast %cst_103 : f32 to vector<2x128xf32>
    %212 = arith.mulf %211, %208 : vector<2x128xf32>
    %213 = arith.select %210, %208, %212 : vector<2x128xi1>, vector<2x128xf32>
    %cst_104 = arith.constant dense<0.000000e+00> : vector<2x64xf32>
    %214 = tpu.matmul %213, %4, %cst_104 {dimension_numbers = #tpu.dot_dimension_numbers<[1], [0], [0], [1], [0, 0, 1, 1], [], []>} : vector<2x128xf32>, vector<128x64xf32>, vector<2x64xf32> -> vector<2x64xf32>
    %215 = vector.broadcast %5 : vector<1x64xf32> to vector<2x64xf32>
    %216 = arith.addf %214, %215 : vector<2x64xf32>
    %cst_105 = arith.constant 0.000000e+00 : f32
    %217 = vector.broadcast %cst_105 : f32 to vector<2x64xf32>
    %218 = arith.cmpf oge, %216, %217 : vector<2x64xf32>
    %cst_106 = arith.constant 0.00999999977 : f32
    %219 = vector.broadcast %cst_106 : f32 to vector<2x64xf32>
    %220 = arith.mulf %219, %216 : vector<2x64xf32>
    %221 = arith.select %218, %216, %220 : vector<2x64xi1>, vector<2x64xf32>
    %cst_107 = arith.constant dense<0.000000e+00> : vector<2x32xf32>
    %222 = tpu.matmul %221, %6, %cst_107 {dimension_numbers = #tpu.dot_dimension_numbers<[1], [0], [0], [1], [0, 0, 1, 1], [], []>} : vector<2x64xf32>, vector<64x32xf32>, vector<2x32xf32> -> vector<2x32xf32>
    %223 = vector.broadcast %7 : vector<1x32xf32> to vector<2x32xf32>
    %224 = arith.addf %222, %223 : vector<2x32xf32>
    %cst_108 = arith.constant 0.000000e+00 : f32
    %225 = vector.broadcast %cst_108 : f32 to vector<2x32xf32>
    %226 = arith.cmpf oge, %224, %225 : vector<2x32xf32>
    %cst_109 = arith.constant 0.00999999977 : f32
    %227 = vector.broadcast %cst_109 : f32 to vector<2x32xf32>
    %228 = arith.mulf %227, %224 : vector<2x32xf32>
    %229 = arith.select %226, %224, %228 : vector<2x32xi1>, vector<2x32xf32>
    %cst_110 = arith.constant dense<0.000000e+00> : vector<2x1xf32>
    %230 = tpu.matmul %229, %8, %cst_110 {dimension_numbers = #tpu.dot_dimension_numbers<[1], [0], [0], [1], [0, 0, 1, 1], [], []>} : vector<2x32xf32>, vector<32x1xf32>, vector<2x1xf32> -> vector<2x1xf32>
    %231 = vector.broadcast %9 : vector<1x1xf32> to vector<2x1xf32>
    %232 = arith.addf %230, %231 : vector<2x1xf32>
    %c0_111 = arith.constant 0 : index
    %c0_112 = arith.constant 0 : index
    %233 = vector.load %arg13[%c0_111, %c0_112] : memref<2x1xf32, #tpu.memory_space<vmem>>, vector<2x1xf32>
    tpu.vector_store %arg13[%c0_111, %c0_112], %232 {strides = array<i32>} : memref<2x1xf32, #tpu.memory_space<vmem>>, vector<2x1xf32>,
    return
  }
  func.func @transform_0(%arg0: i32) -> (i32, i32, i32) {
    %c0_i32 = arith.constant 0 : i32
    %c0_i32_0 = arith.constant 0 : i32
    %c0_i32_1 = arith.constant 0 : i32
    return %c0_i32, %arg0, %c0_i32_0 : i32, i32, i32
  }
  func.func @transform_1(%arg0: i32) -> (i32, i32) {
    %c0_i32 = arith.constant 0 : i32
    %c0_i32_0 = arith.constant 0 : i32
    %c0_i32_1 = arith.constant 0 : i32
    return %c0_i32, %c0_i32_0 : i32, i32
  }
  func.func @transform_2(%arg0: i32) -> (i32, i32) {
    %c0_i32 = arith.constant 0 : i32
    %c0_i32_0 = arith.constant 0 : i32
    %c0_i32_1 = arith.constant 0 : i32
    return %c0_i32, %c0_i32_0 : i32, i32
  }
  func.func @transform_3(%arg0: i32) -> (i32, i32) {
    %c0_i32 = arith.constant 0 : i32
    %c0_i32_0 = arith.constant 0 : i32
    %c0_i32_1 = arith.constant 0 : i32
    return %c0_i32, %c0_i32_0 : i32, i32
  }
  func.func @transform_4(%arg0: i32) -> (i32, i32) {
    %c0_i32 = arith.constant 0 : i32
    %c0_i32_0 = arith.constant 0 : i32
    %c0_i32_1 = arith.constant 0 : i32
    return %c0_i32, %c0_i32_0 : i32, i32
  }
  func.func @transform_5(%arg0: i32) -> (i32, i32) {
    %c0_i32 = arith.constant 0 : i32
    %c0_i32_0 = arith.constant 0 : i32
    %c0_i32_1 = arith.constant 0 : i32
    return %c0_i32, %c0_i32_0 : i32, i32
  }
  func.func @transform_6(%arg0: i32) -> (i32, i32) {
    %c0_i32 = arith.constant 0 : i32
    %c0_i32_0 = arith.constant 0 : i32
    %c0_i32_1 = arith.constant 0 : i32
    return %c0_i32, %c0_i32_0 : i32, i32
  }
  func.func @transform_7(%arg0: i32) -> (i32, i32) {
    %c0_i32 = arith.constant 0 : i32
    %c0_i32_0 = arith.constant 0 : i32
    %c0_i32_1 = arith.constant 0 : i32
    return %c0_i32, %c0_i32_0 : i32, i32
  }
  func.func @transform_8(%arg0: i32) -> (i32, i32) {
    %c0_i32 = arith.constant 0 : i32
    %c0_i32_0 = arith.constant 0 : i32
    %c0_i32_1 = arith.constant 0 : i32
    return %c0_i32, %c0_i32_0 : i32, i32
  }
  func.func @transform_9(%arg0: i32) -> (i32, i32) {
    %c0_i32 = arith.constant 0 : i32
    %c0_i32_0 = arith.constant 0 : i32
    %c0_i32_1 = arith.constant 0 : i32
    return %c0_i32, %c0_i32_0 : i32, i32
  }
  func.func @transform_10(%arg0: i32) -> (i32, i32) {
    %c0_i32 = arith.constant 0 : i32
    %c0_i32_0 = arith.constant 0 : i32
    %c0_i32_1 = arith.constant 0 : i32
    return %c0_i32, %c0_i32_0 : i32, i32
  }
  func.func @transform_11(%arg0: i32) -> (i32, i32) {
    %c0_i32 = arith.constant 0 : i32
    %c0_i32_0 = arith.constant 0 : i32
    %c0_i32_1 = arith.constant 0 : i32
    return %c0_i32, %c0_i32_0 : i32, i32
  }
  func.func @transform_12(%arg0: i32) -> (i32, i32) {
    %c0_i32 = arith.constant 0 : i32
    %c0_i32_0 = arith.constant 0 : i32
    return %arg0, %c0_i32 : i32, i32
  }
}

</mosaic_0001>

<bundles_post_ra>
// kernel: lstm_model_forward.1
= control target key start
LH: loop header
LB: loop body
LE: loop exit
PB: predicated region body
PF: predicated region fallthrough
CT: control target
= control target key end

     0   :  { %vm107_vm0 = vcmask 1043456   ;;  %vm103_vm1 = vcmask 31744   ;;  %v776_v18 = vmov 0.0   ;;  %v97_v19 = vlaneseq  ;;  %s778_s20 = smov 32   ;;  %s1296_s3 = inlined_call_operand.vmem [shape: f32[128,128], index: 3, kind: input, shape index: {}]   ;;  %s1297_s1 = inlined_call_operand.vmem [shape: f32[4,128], index: 1, kind: input, shape index: {}]   ;;  %s1298_s0 = inlined_call_operand.vmem [shape: f32[8,2,4], index: 0, kind: input, shape index: {}]   ;;  %s1299_s2 = inlined_call_operand.vmem [shape: f32[1,128], index: 2, kind: input, shape index: {}]   ;;  %s1300_s4 = inlined_call_operand.vmem [shape: f32[1,128], index: 4, kind: input, shape index: {}]   ;;  %s1301_s6 = inlined_call_operand.vmem [shape: f32[128,64], index: 6, kind: input, shape index: {}]   ;;  %s1302_s5 = inlined_call_operand.vmem [shape: f32[1,128], index: 5, kind: input, shape index: {}]   ;;  %s1303_s7 = inlined_call_operand.vmem [shape: f32[1,64], index: 7, kind: input, shape index: {}]   ;;  %s1304_s8 = inlined_call_operand.vmem [shape: f32[64,32], index: 8, kind: input, shape index: {}]   ;;  %s1305_s9 = inlined_call_operand.vmem [shape: f32[1,32], index: 9, kind: input, shape index: {}]   ;;  %s1306_s10 = inlined_call_operand.vmem [shape: f32[32,1], index: 10, kind: input, shape index: {}]   ;;  %s1307_s11 = inlined_call_operand.<no memory space> [shape: f32[1,1], index: 11, kind: input, shape index: {}]   ;;  %s1308_s12 = inlined_call_operand.vmem [shape: f32[2,1], index: 12, kind: output, shape index: {}]  }
   0x1   :  { %v847_v0 = vld [vmem:[%s1296_s3 + $0x78] sm:$0xff]  ;;  %v852_v1 = vld [vmem:[%s1296_s3 + $0x70] sm:$0xff]  ;;  %v858_v2 = vld [vmem:[%s1296_s3 + $0x68] sm:$0xff]  ;;  %vm650_vm7 = vcmask 523264   ;;  %vm680_vm9 = vcmask 261120   ;;  %vm704_vm10 = vcmask 1024  }
   0x2   :  { %306 = vmatpush.msra.mxu0 %v847_v0  ;;  %v864_v3 = vld [vmem:[%s1297_s1] sm:$0xf]  ;;  %v883_v6 = vld [vmem:[%s1296_s3 + $0x58] sm:$0xff]  ;;  %v895_v7 = vld [vmem:[%s1296_s3 + $0x50] sm:$0xff]  ;;  %v98_v22 = vand.u32 127, %v97_v19 }
   0x3   :  { %v869_v4 = vld [vmem:[%s1296_s3 + $0x60] sm:$0xff]  ;;  %710 = vmatpush.msk.msra.mxu3 %vm107_vm0, %v864_v3  ;;  %713 = vmatpush.msk.msra.mxu1 %vm107_vm0, %v864_v3  ;;  %v905_v8 = vld [vmem:[%s1296_s3 + $0x48] sm:$0xff]  ;;  %v917_v10 = vld [vmem:[%s1296_s3 + $0x38] sm:$0xff] }
   0x4   :  { %307 = vmatpush.msra.mxu0 %v852_v1  ;;  %v102_v5 = vld [vmem:[%s1298_s0] sm:$0x3]  ;;  %716 = vmatpush.msk.msra.mxu2 %vm107_vm0, %v864_v3  ;;  %v923_v11 = vld [vmem:[%s1296_s3 + $0x30] sm:$0xff]  ;;  %v929_v12 = vld [vmem:[%s1296_s3 + $0x28] sm:$0xff]  ;;  %vm99_vm2 = vcmp.ge.s32.totalorder %v98_v22, 64  ;;  %vm100_vm3 = vcmp.lt.s32.totalorder %v98_v22, 96 }
   0x5   :  { %711 = vmatmul.msk.f32.vlgmr.msra.gmra.mxu3 %vm103_vm1, %v102_v5  ;;  %725 = vmatpush.msk.msrb.mxu1 %vm107_vm0, %v864_v3  ;;  %v911_v9 = vld [vmem:[%s1296_s3 + $0x40] sm:$0xff]  ;;  %v941_v14 = vld [vmem:[%s1296_s3 + $0x18] sm:$0xff]  ;;  %v947_v15 = vld [vmem:[%s1296_s3 + $0x10] sm:$0xff] }
   0x6   :  { %308 = vmatpush.msra.mxu0 %v858_v2  ;;  %722 = vmatpush.msk.msrb.mxu2 %vm107_vm0, %v864_v3  ;;  %v935_v13 = vld [vmem:[%s1296_s3 + $0x20] sm:$0xff]  ;;  %v953_v16 = vld [vmem:[%s1296_s3 + $0x8] sm:$0xff]  ;;  %vm985_vm4 = vmand %vm99_vm2, %vm100_vm3 }
   0x7   :  { %719 = vmatpush.msk.msrb.mxu3 %vm107_vm0, %v864_v3  ;;  %v959_v17 = vld [vmem:[%s1296_s3] sm:$0xff]  ;;  %v724_v39 = vld [vmem:[%s1298_s0 + $0xa] sm:$0x3]  ;;  %v721_v57 = vld [vmem:[%s1298_s0 + $0x8] sm:$0x3] }
   0x8   :  { %309 = vmatpush.msra.mxu0 %v869_v4  ;;  %v982_v20 = vld [vmem:[%s1299_s2] ss:$0 sm:$0xff]  ;;  %s777_s2 = smov 64   ;;  %v712_v35 = vld [vmem:[%s1298_s0 + $0x2] sm:$0x3]  ;;  %v75_v26 = vld [vmem:[%s1301_s6 + $0x68] sm:$0xff] }
   0x9   :  { %731 = vmatpush.msk.msra.mxu3 %vm107_vm0, %v864_v3  ;;  %714 = vmatmul.msk.f32.vlgmr.msra.gmra.mxu1 %vm103_vm1, %v712_v35  ;;  %v715_v56 = vld [vmem:[%s1298_s0 + $0x4] sm:$0x3]  ;;  %v727_v61 = vld [vmem:[%s1298_s0 + $0xc] sm:$0x3] }
   0xa   :  { %310 = vmatpush.msra.mxu0 %v883_v6  ;;  %344 = vmatpush.msra.mxu1 %v847_v0 }
   0xb   :  { %717 = vmatmul.msk.f32.vlgmr.msra.gmra.mxu2 %vm103_vm1, %v715_v56 }
   0xc   :  { %311 = vmatpush.msra.mxu0 %v895_v7  ;;  %345 = vmatpush.msra.mxu1 %v852_v1 }
   0xd   :  { %728 = vmatpush.msk.msra.mxu2 %vm107_vm0, %v864_v3 }
   0xe   :  { %312 = vmatpush.msra.mxu0 %v905_v8  ;;  %346 = vmatpush.msra.mxu1 %v858_v2 }
  0x10   :  { %313 = vmatpush.msra.mxu0 %v911_v9  ;;  %347 = vmatpush.msra.mxu1 %v869_v4 }
  0x11   :  { %726 = vmatmul.msk.f32.vlgmr.msrb.gmra.mxu1 %vm103_vm1, %v724_v39 }
  0x12   :  { %314 = vmatpush.msra.mxu0 %v917_v10  ;;  %348 = vmatpush.msra.mxu1 %v883_v6 }
  0x13   :  { %723 = vmatmul.msk.f32.vlgmr.msrb.gmra.mxu2 %vm103_vm1, %v721_v57 }
  0x14   :  { %315 = vmatpush.msra.mxu0 %v923_v11  ;;  %349 = vmatpush.msra.mxu1 %v895_v7 }
  0x15   :  { %382 = vmatpush.msrb.mxu2 %v847_v0 }
  0x16   :  { %316 = vmatpush.msra.mxu0 %v929_v12  ;;  %350 = vmatpush.msra.mxu1 %v905_v8 }
  0x17   :  { %383 = vmatpush.msrb.mxu2 %v852_v1 }
  0x18   :  { %317 = vmatpush.msra.mxu0 %v935_v13  ;;  %351 = vmatpush.msra.mxu1 %v911_v9 }
  0x19   :  { %384 = vmatpush.msrb.mxu2 %v858_v2 }
  0x1a   :  { %318 = vmatpush.msra.mxu0 %v941_v14  ;;  %352 = vmatpush.msra.mxu1 %v917_v10 }
  0x1b   :  { %385 = vmatpush.msrb.mxu2 %v869_v4 }
  0x1c   :  { %319 = vmatpush.msra.mxu0 %v947_v15  ;;  %353 = vmatpush.msra.mxu1 %v923_v11 }
  0x1d   :  { %386 = vmatpush.msrb.mxu2 %v883_v6 }
  0x1e   :  { %320 = vmatpush.msra.mxu0 %v953_v16  ;;  %354 = vmatpush.msra.mxu1 %v929_v12 }
  0x1f   :  { %387 = vmatpush.msrb.mxu2 %v895_v7 }
  0x20   :  { %321 = vmatpush.msra.mxu0 %v959_v17  ;;  %355 = vmatpush.msra.mxu1 %v935_v13 }
  0x21   :  { %322 = vmatmul.f32.vlgmr.msra.gmra.mxu0 %v776_v18  ;;  %388 = vmatpush.msrb.mxu2 %v905_v8 }
  0x22   :  { %458 = vmatpush.msrb.mxu0 %v847_v0  ;;  %356 = vmatpush.msra.mxu1 %v941_v14 }
  0x23   :  { %389 = vmatpush.msrb.mxu2 %v911_v9 }
  0x24   :  { %459 = vmatpush.msrb.mxu0 %v852_v1  ;;  %357 = vmatpush.msra.mxu1 %v947_v15 }
  0x25   :  { %390 = vmatpush.msrb.mxu2 %v917_v10 }
  0x26   :  { %460 = vmatpush.msrb.mxu0 %v858_v2  ;;  %358 = vmatpush.msra.mxu1 %v953_v16 }
  0x27   :  { %391 = vmatpush.msrb.mxu2 %v923_v11 }
  0x28   :  { %461 = vmatpush.msrb.mxu0 %v869_v4  ;;  %359 = vmatpush.msra.mxu1 %v959_v17 }
  0x29   :  { %392 = vmatpush.msrb.mxu2 %v929_v12 }
  0x2a   :  { %462 = vmatpush.msrb.mxu0 %v883_v6  ;;  %496 = vmatpush.msrb.mxu1 %v847_v0 }
  0x2b   :  { %393 = vmatpush.msrb.mxu2 %v935_v13 }
  0x2c   :  { %463 = vmatpush.msrb.mxu0 %v895_v7  ;;  %497 = vmatpush.msrb.mxu1 %v852_v1 }
  0x2d   :  { %394 = vmatpush.msrb.mxu2 %v941_v14 }
  0x2e   :  { %464 = vmatpush.msrb.mxu0 %v905_v8  ;;  %498 = vmatpush.msrb.mxu1 %v858_v2 }
  0x2f   :  { %395 = vmatpush.msrb.mxu2 %v947_v15 }
  0x30   :  { %465 = vmatpush.msrb.mxu0 %v911_v9  ;;  %499 = vmatpush.msrb.mxu1 %v869_v4 }
  0x31   :  { %396 = vmatpush.msrb.mxu2 %v953_v16 }
  0x32   :  { %466 = vmatpush.msrb.mxu0 %v917_v10  ;;  %500 = vmatpush.msrb.mxu1 %v883_v6 }
  0x33   :  { %397 = vmatpush.msrb.mxu2 %v959_v17 }
  0x34   :  { %467 = vmatpush.msrb.mxu0 %v923_v11  ;;  %501 = vmatpush.msrb.mxu1 %v895_v7 }
  0x35   :  { %729 = vmatmul.msk.f32.vlgmr.msra.gmra.mxu2 %vm103_vm1, %v727_v61 }
  0x36   :  { %468 = vmatpush.msrb.mxu0 %v929_v12  ;;  %502 = vmatpush.msrb.mxu1 %v905_v8 }
  0x37   :  { %534 = vmatpush.msra.mxu2 %v847_v0 }
  0x38   :  { %469 = vmatpush.msrb.mxu0 %v935_v13  ;;  %503 = vmatpush.msrb.mxu1 %v911_v9 }
  0x39   :  { %535 = vmatpush.msra.mxu2 %v852_v1 }
  0x3a   :  { %470 = vmatpush.msrb.mxu0 %v941_v14  ;;  %504 = vmatpush.msrb.mxu1 %v917_v10 }
  0x3b   :  { %536 = vmatpush.msra.mxu2 %v858_v2 }
  0x3c   :  { %471 = vmatpush.msrb.mxu0 %v947_v15  ;;  %505 = vmatpush.msrb.mxu1 %v923_v11 }
  0x3d   :  { %537 = vmatpush.msra.mxu2 %v869_v4 }
  0x3e   :  { %472 = vmatpush.msrb.mxu0 %v953_v16  ;;  %506 = vmatpush.msrb.mxu1 %v929_v12 }
  0x3f   :  { %538 = vmatpush.msra.mxu2 %v883_v6 }
  0x40   :  { %473 = vmatpush.msrb.mxu0 %v959_v17  ;;  %507 = vmatpush.msrb.mxu1 %v935_v13 }
  0x41   :  { %539 = vmatpush.msra.mxu2 %v895_v7 }
  0x42   :  { %508 = vmatpush.msrb.mxu1 %v941_v14 }
  0x43   :  { %540 = vmatpush.msra.mxu2 %v905_v8 }
  0x44   :  { %509 = vmatpush.msrb.mxu1 %v947_v15 }
  0x45   :  { %541 = vmatpush.msra.mxu2 %v911_v9 }
  0x46   :  { %510 = vmatpush.msrb.mxu1 %v953_v16 }
  0x47   :  { %542 = vmatpush.msra.mxu2 %v917_v10 }
  0x48   :  { %511 = vmatpush.msrb.mxu1 %v959_v17 }
  0x49   :  { %543 = vmatpush.msra.mxu2 %v923_v11 }
  0x4b   :  { %544 = vmatpush.msra.mxu2 %v929_v12 }
  0x4d   :  { %545 = vmatpush.msra.mxu2 %v935_v13 }
  0x4f   :  { %546 = vmatpush.msra.mxu2 %v941_v14 }
  0x51   :  { %547 = vmatpush.msra.mxu2 %v947_v15 }
  0x53   :  { %548 = vmatpush.msra.mxu2 %v953_v16 }
  0x55   :  { %549 = vmatpush.msra.mxu2 %v959_v17 }
  0x86   :  { %v153_v43 = vpop.f32.mrf.mxu1 }
  0x87   :  { %v154_v45 = vadd.f32 %v982_v20, %v153_v43 }
  0x88   :  { %v128_v21 = vpop.f32.mrf.mxu3 }
  0x89   :  { %v129_v23 = vadd.f32 %v982_v20, %v128_v21 }
  0x8e   :  { %v1036_v44 = vpop.f32.mrf.mxu1  ;;  %v178_v5 = vpop.f32.mrf.mxu2 }
  0x8f   :  { %v179_v21 = vadd.f32 %v982_v20, %v178_v5 }
  0x96   :  { %v1095_v18 = vpop.f32.mrf.mxu2 }
  0x9e   :  { %v323_v24 = vpop.f32.mrf.mxu0 }
  0x9f   :  { %v326_v25 = vadd.f32 %v323_v24, %v129_v23 }
  0xa1   :  { %v327_v27 = vmul.f32 0.5, %v326_v25 }
  0xa3   :  { %v328_v28 = vsel %vm985_vm4, %v326_v25, %v327_v27 }
  0xa4   :  { %744 = vtanh.f32 %v328_v28 }
  0xaa   :  { %v745_v29 = vpop.eup %744 }
  0xab   :  { %v330_v30 = vadd.f32 1.0, %v745_v29 }
  0xad   :  { %v331_v31 = vmul.f32 0.5, %v330_v30 }
  0xaf   :  { %v332_v32 = vsel %vm985_vm4, %v745_v29, %v331_v31 }
  0xb0   :  { %333 = vrot.lane.b32.xlu0 %v332_v32, %s777_s2  ;;  %v336_v36 = vmul.f32 0.0, %v332_v32 }
  0xb8   :  { %v1097_v19 = vpop.f32.mrf.mxu2 }
 0x122   :  { %v334_v33 = vpop.permute.xlu0 %333 }
 0x123   :  { %v335_v34 = vmul.f32 %v334_v33, %v332_v32  ;;  %v718_v33 = vld [vmem:[%s1298_s0 + $0x6] sm:$0x3] }
 0x124   :  { %720 = vmatmul.msk.f32.vlgmr.msrb.gmra.mxu3 %vm103_vm1, %v718_v33  ;;  %v279_v33 = vadd.f32 %v982_v20, %v1097_v19 }
 0x125   :  { %337 = vrot.lane.b32.xlu0 %v335_v34, %s778_s20  ;;  %420 = vmatpush.msrb.mxu3 %v847_v0 }
 0x127   :  { %421 = vmatpush.msrb.mxu3 %v852_v1 }
 0x129   :  { %422 = vmatpush.msrb.mxu3 %v858_v2 }
 0x12b   :  { %423 = vmatpush.msrb.mxu3 %v869_v4 }
 0x12d   :  { %424 = vmatpush.msrb.mxu3 %v883_v6 }
 0x12f   :  { %425 = vmatpush.msrb.mxu3 %v895_v7 }
 0x131   :  { %426 = vmatpush.msrb.mxu3 %v905_v8 }
 0x133   :  { %427 = vmatpush.msrb.mxu3 %v911_v9 }
 0x135   :  { %428 = vmatpush.msrb.mxu3 %v917_v10 }
 0x137   :  { %429 = vmatpush.msrb.mxu3 %v923_v11 }
 0x139   :  { %430 = vmatpush.msrb.mxu3 %v929_v12 }
 0x13b   :  { %431 = vmatpush.msrb.mxu3 %v935_v13 }
 0x13d   :  { %432 = vmatpush.msrb.mxu3 %v941_v14 }
 0x13f   :  { %433 = vmatpush.msrb.mxu3 %v947_v15 }
 0x141   :  { %434 = vmatpush.msrb.mxu3 %v953_v16 }
 0x143   :  { %435 = vmatpush.msrb.mxu3 %v959_v17 }
 0x197   :  { %v338_v37 = vpop.permute.xlu0 %337 }
 0x198   :  { %v339_v38 = vadd.f32 %v338_v37, %v336_v36  ;;  %v730_v37 = vld [vmem:[%s1298_s0 + $0xe] sm:$0x3] }
 0x199   :  { %732 = vmatmul.msk.f32.vlgmr.msra.gmra.mxu3 %vm103_vm1, %v730_v37 }
 0x19a   :  { %340 = vrot.lane.b32.xlu1 %v339_v38, %s777_s2  ;;  %572 = vmatpush.msra.mxu3 %v847_v0 }
 0x19c   :  { %573 = vmatpush.msra.mxu3 %v852_v1 }
 0x19e   :  { %574 = vmatpush.msra.mxu3 %v858_v2 }
 0x1a0   :  { %575 = vmatpush.msra.mxu3 %v869_v4 }
 0x1a2   :  { %576 = vmatpush.msra.mxu3 %v883_v6 }
 0x1a4   :  { %577 = vmatpush.msra.mxu3 %v895_v7 }
 0x1a6   :  { %578 = vmatpush.msra.mxu3 %v905_v8 }
 0x1a7   :  { %v203_v4 = vpop.f32.mrf.mxu3 }
 0x1a8   :  { %579 = vmatpush.msra.mxu3 %v911_v9  ;;  %v204_v7 = vadd.f32 %v982_v20, %v203_v4 }
 0x1aa   :  { %580 = vmatpush.msra.mxu3 %v917_v10 }
 0x1ac   :  { %581 = vmatpush.msra.mxu3 %v923_v11 }
 0x1ae   :  { %582 = vmatpush.msra.mxu3 %v929_v12 }
 0x1b0   :  { %583 = vmatpush.msra.mxu3 %v935_v13 }
 0x1b2   :  { %584 = vmatpush.msra.mxu3 %v941_v14 }
 0x1b4   :  { %585 = vmatpush.msra.mxu3 %v947_v15 }
 0x1b6   :  { %586 = vmatpush.msra.mxu3 %v953_v16 }
 0x1b8   :  { %587 = vmatpush.msra.mxu3 %v959_v17 }
 0x20c   :  { %v341_v40 = vpop.permute.xlu1 %340 }
 0x20d   :  { %746 = vtanh.f32 %v341_v40 }
 0x213   :  { %v747_v41 = vpop.eup %746 }
 0x214   :  { %v343_v42 = vmul.f32 %v747_v41, %v332_v32 }
 0x216   :  { %360 = vmatmul.f32.vlgmr.msra.gmra.mxu1 %v343_v42 }
 0x21c   :  { %v1148_v6 = vpop.f32.mrf.mxu3 }
 0x293   :  { %v361_v46 = vpop.f32.mrf.mxu1 }
 0x294   :  { %v364_v47 = vadd.f32 %v361_v46, %v154_v45  ;;  %v229_v45 = vadd.f32 %v982_v20, %v1095_v18 }
 0x296   :  { %v365_v48 = vmul.f32 0.5, %v364_v47 }
 0x298   :  { %v366_v49 = vsel %vm985_vm4, %v364_v47, %v365_v48 }
 0x299   :  { %748 = vtanh.f32 %v366_v49 }
 0x29f   :  { %v749_v50 = vpop.eup %748 }
 0x2a0   :  { %v368_v51 = vadd.f32 1.0, %v749_v50 }
 0x2a2   :  { %v369_v52 = vmul.f32 0.5, %v368_v51 }
 0x2a4   :  { %v370_v53 = vsel %vm985_vm4, %v749_v50, %v369_v52 }
 0x2a5   :  { %371 = vrot.lane.b32.xlu1 %v370_v53, %s777_s2  ;;  %v374_v58 = vmul.f32 %v370_v53, %v339_v38 }
 0x317   :  { %v372_v54 = vpop.permute.xlu1 %371 }
 0x318   :  { %v373_v55 = vmul.f32 %v372_v54, %v370_v53 }
 0x31a   :  { %375 = vrot.lane.b32.xlu2 %v373_v55, %s778_s20 }
 0x374   :  { %v376_v59 = vpop.permute.xlu2 %375 }
 0x375   :  { %v1065_v60 = vadd.f32 %v376_v59, %v374_v58 }
 0x377   :  { %378 = vrot.lane.b32.xlu2 %v1065_v60, %s777_s2 }
 0x3d1   :  { %v379_v62 = vpop.permute.xlu2 %378 }
 0x3d2   :  { %750 = vtanh.f32 %v379_v62  ;;  %v254_v62 = vadd.f32 %v982_v20, %v1036_v44 }
 0x3d8   :  { %v751_v63 = vpop.eup %750 }
 0x3d9   :  { %v381_v3 = vmul.f32 %v751_v63, %v370_v53 }
 0x3db   :  { %398 = vmatmul.f32.vlgmr.msrb.gmra.mxu2 %v381_v3 }
 0x45e   :  { %v399_v22 = vpop.f32.mrf.mxu2 }
 0x45f   :  { %v402_v23 = vadd.f32 %v399_v22, %v179_v21 }
 0x461   :  { %v403_v24 = vmul.f32 0.5, %v402_v23 }
 0x463   :  { %v404_v25 = vsel %vm985_vm4, %v402_v23, %v403_v24 }
 0x464   :  { %752 = vtanh.f32 %v404_v25 }
 0x46a   :  { %v753_v27 = vpop.eup %752 }
 0x46b   :  { %v406_v28 = vadd.f32 1.0, %v753_v27 }
 0x46d   :  { %v407_v29 = vmul.f32 0.5, %v406_v28 }
 0x46f   :  { %v408_v30 = vsel %vm985_vm4, %v753_v27, %v407_v29 }
 0x470   :  { %409 = vrot.lane.b32.xlu0 %v408_v30, %s777_s2  ;;  %v412_v34 = vmul.f32 %v408_v30, %v1065_v60 }
 0x4e2   :  { %v410_v31 = vpop.permute.xlu0 %409 }
 0x4e3   :  { %v411_v32 = vmul.f32 %v410_v31, %v408_v30 }
 0x4e5   :  { %413 = vrot.lane.b32.xlu1 %v411_v32, %s778_s20 }
 0x557   :  { %v414_v35 = vpop.permute.xlu1 %413 }
 0x558   :  { %v415_v36 = vadd.f32 %v414_v35, %v412_v34 }
 0x55a   :  { %416 = vrot.lane.b32.xlu2 %v415_v36, %s777_s2 }
 0x5b4   :  { %v417_v0 = vpop.permute.xlu2 %416 }
 0x5b5   :  { %754 = vtanh.f32 %v417_v0 }
 0x5bb   :  { %v755_v1 = vpop.eup %754 }
 0x5bc   :  { %v419_v2 = vmul.f32 %v755_v1, %v408_v30 }
 0x5be   :  { %436 = vmatmul.f32.vlgmr.msrb.gmra.mxu3 %v419_v2 }
 0x641   :  { %v437_v8 = vpop.f32.mrf.mxu3 }
 0x642   :  { %v440_v9 = vadd.f32 %v437_v8, %v204_v7 }
 0x644   :  { %v441_v10 = vmul.f32 0.5, %v440_v9 }
 0x646   :  { %v442_v11 = vsel %vm985_vm4, %v440_v9, %v441_v10 }
 0x647   :  { %756 = vtanh.f32 %v442_v11 }
 0x64d   :  { %v757_v12 = vpop.eup %756 }
 0x64e   :  { %v444_v13 = vadd.f32 1.0, %v757_v12 }
 0x650   :  { %v445_v14 = vmul.f32 0.5, %v444_v13 }
 0x652   :  { %v446_v15 = vsel %vm985_vm4, %v757_v12, %v445_v14  ;;  %v304_v14 = vadd.f32 %v982_v20, %v1148_v6  ;;  %v77_v20 = vld [vmem:[%s1301_s6 + $0x78] sm:$0xff]  ;;  %v76_v6 = vld [vmem:[%s1301_s6 + $0x70] sm:$0xff] }
 0x653   :  { %447 = vrot.lane.b32.xlu0 %v446_v15, %s777_s2  ;;  %v450_v38 = vmul.f32 %v446_v15, %v415_v36  ;;  %624 = vmatpush.msra.mxu0 %v77_v20 }
 0x655   :  { %625 = vmatpush.msra.mxu0 %v76_v6 }
 0x657   :  { %626 = vmatpush.msra.mxu0 %v75_v26 }
 0x6c5   :  { %v448_v16 = vpop.permute.xlu0 %447 }
 0x6c6   :  { %v449_v17 = vmul.f32 %v448_v16, %v446_v15 }
 0x6c8   :  { %451 = vrot.lane.b32.xlu1 %v449_v17, %s778_s20 }
 0x73a   :  { %v452_v39 = vpop.permute.xlu1 %451 }
 0x73b   :  { %v453_v40 = vadd.f32 %v452_v39, %v450_v38 }
 0x73d   :  { %454 = vrot.lane.b32.xlu2 %v453_v40, %s777_s2 }
 0x797   :  { %v455_v41 = vpop.permute.xlu2 %454 }
 0x798   :  { %758 = vtanh.f32 %v455_v41 }
 0x79e   :  { %v759_v42 = vpop.eup %758 }
 0x79f   :  { %v457_v43 = vmul.f32 %v759_v42, %v446_v15 }
 0x7a1   :  { %474 = vmatmul.f32.vlgmr.msrb.gmra.mxu0 %v457_v43 }
 0x81e   :  { %v475_v46 = vpop.f32.mrf.mxu0 }
 0x81f   :  { %v478_v47 = vadd.f32 %v475_v46, %v229_v45  ;;  %v74_v46 = vld [vmem:[%s1301_s6 + $0x60] sm:$0xff] }
 0x820   :  { %627 = vmatpush.msra.mxu0 %v74_v46 }
 0x821   :  { %v479_v48 = vmul.f32 0.5, %v478_v47 }
 0x823   :  { %v480_v49 = vsel %vm985_vm4, %v478_v47, %v479_v48  ;;  %v73_v47 = vld [vmem:[%s1301_s6 + $0x58] sm:$0xff]  ;;  %v72_v48 = vld [vmem:[%s1301_s6 + $0x50] sm:$0xff] }
 0x824   :  { %760 = vtanh.f32 %v480_v49  ;;  %628 = vmatpush.msra.mxu0 %v73_v47  ;;  %v71_v49 = vld [vmem:[%s1301_s6 + $0x48] sm:$0xff] }
 0x826   :  { %629 = vmatpush.msra.mxu0 %v72_v48 }
 0x828   :  { %630 = vmatpush.msra.mxu0 %v71_v49 }
 0x82a   :  { %v761_v50 = vpop.eup %760 }
 0x82b   :  { %v482_v51 = vadd.f32 1.0, %v761_v50 }
 0x82d   :  { %v483_v52 = vmul.f32 0.5, %v482_v51 }
 0x82f   :  { %v484_v53 = vsel %vm985_vm4, %v761_v50, %v483_v52  ;;  %v70_v50 = vld [vmem:[%s1301_s6 + $0x40] sm:$0xff] }
 0x830   :  { %485 = vrot.lane.b32.xlu0 %v484_v53, %s777_s2  ;;  %v488_v56 = vmul.f32 %v484_v53, %v453_v40  ;;  %631 = vmatpush.msra.mxu0 %v70_v50 }
 0x8a2   :  { %v486_v54 = vpop.permute.xlu0 %485 }
 0x8a3   :  { %v487_v55 = vmul.f32 %v486_v54, %v484_v53  ;;  %v69_v54 = vld [vmem:[%s1301_s6 + $0x38] sm:$0xff] }
 0x8a4   :  { %632 = vmatpush.msra.mxu0 %v69_v54 }
 0x8a5   :  { %489 = vrot.lane.b32.xlu1 %v487_v55, %s778_s20  ;;  %v68_v55 = vld [vmem:[%s1301_s6 + $0x30] sm:$0xff] }
 0x8a6   :  { %633 = vmatpush.msra.mxu0 %v68_v55 }
 0x917   :  { %v490_v57 = vpop.permute.xlu1 %489 }
 0x918   :  { %v491_v58 = vadd.f32 %v490_v57, %v488_v56  ;;  %v67_v56 = vld [vmem:[%s1301_s6 + $0x28] sm:$0xff]  ;;  %v66_v57 = vld [vmem:[%s1301_s6 + $0x20] sm:$0xff] }
 0x919   :  { %634 = vmatpush.msra.mxu0 %v67_v56 }
 0x91a   :  { %492 = vrot.lane.b32.xlu2 %v491_v58, %s777_s2 }
 0x91b   :  { %635 = vmatpush.msra.mxu0 %v66_v57 }
 0x974   :  { %v493_v59 = vpop.permute.xlu2 %492 }
 0x975   :  { %762 = vtanh.f32 %v493_v59  ;;  %v64_v59 = vld [vmem:[%s1301_s6 + $0x10] sm:$0xff] }
 0x97b   :  { %v763_v60 = vpop.eup %762 }
 0x97c   :  { %v495_v61 = vmul.f32 %v763_v60, %v484_v53  ;;  %v63_v60 = vld [vmem:[%s1301_s6 + $0x8] sm:$0xff] }
 0x97e   :  { %512 = vmatmul.f32.vlgmr.msrb.gmra.mxu1 %v495_v61  ;;  %v62_v61 = vld [vmem:[%s1301_s6] sm:$0xff] }
 0x9fb   :  { %v513_v63 = vpop.f32.mrf.mxu1 }
 0x9fc   :  { %v516_v3 = vadd.f32 %v513_v63, %v254_v62  ;;  %v86_v62 = vld [vmem:[%s1304_s8 + $0x38] sm:$0xff]  ;;  %v85_v63 = vld [vmem:[%s1304_s8 + $0x30] sm:$0xff] }
 0x9fd   :  { %662 = vmatpush.msra.mxu1 %v86_v62 }
 0x9fe   :  { %v517_v5 = vmul.f32 0.5, %v516_v3 }
 0x9ff   :  { %663 = vmatpush.msra.mxu1 %v85_v63 }
 0xa00   :  { %v518_v18 = vsel %vm985_vm4, %v516_v3, %v517_v5  ;;  %v84_v3 = vld [vmem:[%s1304_s8 + $0x28] sm:$0xff]  ;;  %v83_v5 = vld [vmem:[%s1304_s8 + $0x20] sm:$0xff] }
 0xa01   :  { %764 = vtanh.f32 %v518_v18  ;;  %664 = vmatpush.msra.mxu1 %v84_v3  ;;  %v82_v18 = vld [vmem:[%s1304_s8 + $0x18] sm:$0xff] }
 0xa03   :  { %665 = vmatpush.msra.mxu1 %v83_v5 }
 0xa05   :  { %666 = vmatpush.msra.mxu1 %v82_v18 }
 0xa07   :  { %v765_v21 = vpop.eup %764 }
 0xa08   :  { %v520_v22 = vadd.f32 1.0, %v765_v21 }
 0xa0a   :  { %v521_v23 = vmul.f32 0.5, %v520_v22  ;;  %v739_v22 = vld [vmem:[%s1300_s4] ss:$0 sm:$0xff] }
 0xa0c   :  { %v522_v24 = vsel %vm985_vm4, %v765_v21, %v521_v23 }
 0xa0d   :  { %523 = vrot.lane.b32.xlu0 %v522_v24, %s777_s2  ;;  %v526_v44 = vmul.f32 %v522_v24, %v491_v58  ;;  %v65_v58 = vld [vmem:[%s1301_s6 + $0x18] sm:$0xff] }
 0xa0e   :  { %636 = vmatpush.msra.mxu0 %v65_v58 }
 0xa10   :  { %637 = vmatpush.msra.mxu0 %v64_v59 }
 0xa12   :  { %638 = vmatpush.msra.mxu0 %v63_v60 }
 0xa14   :  { %639 = vmatpush.msra.mxu0 %v62_v61 }
 0xa7f   :  { %v524_v25 = vpop.permute.xlu0 %523 }
 0xa80   :  { %v525_v27 = vmul.f32 %v524_v25, %v522_v24  ;;  %v740_v25 = vld [vmem:[%s1302_s5] ss:$0 sm:$0xff] }
 0xa82   :  { %527 = vrot.lane.b32.xlu1 %v525_v27, %s778_s20 }
 0xaf4   :  { %v528_v28 = vpop.permute.xlu1 %527 }
 0xaf5   :  { %v529_v29 = vadd.f32 %v528_v28, %v526_v44 }
 0xaf7   :  { %530 = vrot.lane.b32.xlu2 %v529_v29, %s777_s2 }
 0xb51   :  { %v531_v30 = vpop.permute.xlu2 %530 }
 0xb52   :  { %766 = vtanh.f32 %v531_v30  ;;  %v81_v30 = vld [vmem:[%s1304_s8 + $0x10] sm:$0xff] }
 0xb53   :  { %667 = vmatpush.msra.mxu1 %v81_v30 }
 0xb58   :  { %v767_v31 = vpop.eup %766 }
 0xb59   :  { %v533_v32 = vmul.f32 %v767_v31, %v522_v24  ;;  %v80_v31 = vld [vmem:[%s1304_s8 + $0x8] sm:$0xff] }
 0xb5a   :  { %668 = vmatpush.msra.mxu1 %v80_v31 }
 0xb5b   :  { %550 = vmatmul.f32.vlgmr.msra.gmra.mxu2 %v533_v32  ;;  %v79_v32 = vld [vmem:[%s1304_s8] sm:$0xff] }
 0xb5c   :  { %669 = vmatpush.msra.mxu1 %v79_v32 }
 0xbde   :  { %v551_v34 = vpop.f32.mrf.mxu2 }
 0xbdf   :  { %v554_v35 = vadd.f32 %v551_v34, %v279_v33  ;;  %v91_v33 = vld [vmem:[%s1306_s10 + $0x18] sm:$0xff]  ;;  %v741_v34 = vld [vmem:[%s1303_s7] ss:$0 sm:$0xff] }
 0xbe0   :  { %696 = vmatpush.msrb.mxu2 %v91_v33 }
 0xbe1   :  { %v555_v36 = vmul.f32 0.5, %v554_v35 }
 0xbe3   :  { %v556_v37 = vsel %vm985_vm4, %v554_v35, %v555_v36 }
 0xbe4   :  { %768 = vtanh.f32 %v556_v37 }
 0xbea   :  { %v769_v0 = vpop.eup %768 }
 0xbeb   :  { %v558_v1 = vadd.f32 1.0, %v769_v0 }
 0xbed   :  { %v559_v2 = vmul.f32 0.5, %v558_v1  ;;  %v90_v1 = vld [vmem:[%s1306_s10 + $0x10] sm:$0xff] }
 0xbee   :  { %697 = vmatpush.msrb.mxu2 %v90_v1 }
 0xbef   :  { %v560_v4 = vsel %vm985_vm4, %v769_v0, %v559_v2  ;;  %v89_v2 = vld [vmem:[%s1306_s10 + $0x8] sm:$0xff] }
 0xbf0   :  { %561 = vrot.lane.b32.xlu0 %v560_v4, %s777_s2  ;;  %v564_v19 = vmul.f32 %v560_v4, %v529_v29  ;;  %698 = vmatpush.msrb.mxu2 %v89_v2 }
 0xc62   :  { %v562_v7 = vpop.permute.xlu0 %561 }
 0xc63   :  { %v563_v8 = vmul.f32 %v562_v7, %v560_v4  ;;  %v17_v7 = vstv %s1307_s11 }
 0xc64   :  { %18 = vst [vmem:[#allocation2] sm:$0x1] %v17_v7 }
 0xc65   :  { %565 = vrot.lane.b32.xlu1 %v563_v8, %s778_s20  ;;  %v742_v8 = vld [vmem:[%s1305_s9] ss:$0 sm:$0xff] }
 0xcd7   :  { %v566_v9 = vpop.permute.xlu1 %565 }
 0xcd8   :  { %v567_v10 = vadd.f32 %v566_v9, %v564_v19 }
 0xcda   :  { %568 = vrot.lane.b32.xlu2 %v567_v10, %s777_s2 }
 0xd34   :  { %v569_v11 = vpop.permute.xlu2 %568 }
 0xd35   :  { %770 = vtanh.f32 %v569_v11 }
 0xd3b   :  { %v771_v12 = vpop.eup %770 }
 0xd3c   :  { %v571_v13 = vmul.f32 %v771_v12, %v560_v4  ;;  %v88_v4 = vld [vmem:[%s1306_s10] sm:$0xff] }
 0xd3d   :  { %699 = vmatpush.msrb.mxu2 %v88_v4  ;;  %v743_v12 = vld [vmem:[#allocation2] ss:$0 sm:$0xff] }
 0xd3e   :  { %588 = vmatmul.f32.vlgmr.msra.gmra.mxu3 %v571_v13 }
 0xdc1   :  { %v589_v15 = vpop.f32.mrf.mxu3 }
 0xdc2   :  { %v592_v16 = vadd.f32 %v589_v15, %v304_v14 }
 0xdc4   :  { %v593_v17 = vmul.f32 0.5, %v592_v16 }
 0xdc6   :  { %v594_v38 = vsel %vm985_vm4, %v592_v16, %v593_v17 }
 0xdc7   :  { %772 = vtanh.f32 %v594_v38 }
 0xdcd   :  { %v773_v39 = vpop.eup %772 }
 0xdce   :  { %v596_v40 = vadd.f32 1.0, %v773_v39 }
 0xdd0   :  { %v597_v41 = vmul.f32 0.5, %v596_v40 }
 0xdd2   :  { %v598_v42 = vsel %vm985_vm4, %v773_v39, %v597_v41 }
 0xdd3   :  { %599 = vrot.lane.b32.xlu0 %v598_v42, %s777_s2  ;;  %v602_v51 = vmul.f32 %v598_v42, %v567_v10 }
 0xe45   :  { %v600_v43 = vpop.permute.xlu0 %599 }
 0xe46   :  { %v601_v45 = vmul.f32 %v600_v43, %v598_v42 }
 0xe48   :  { %603 = vrot.lane.b32.xlu1 %v601_v45, %s778_s20 }
 0xeba   :  { %v604_v52 = vpop.permute.xlu1 %603 }
 0xebb   :  { %v605_v53 = vadd.f32 %v604_v52, %v602_v51 }
 0xebd   :  { %606 = vrot.lane.b32.xlu2 %v605_v53, %s777_s2 }
 0xf17   :  { %v607_v21 = vpop.permute.xlu2 %606 }
 0xf18   :  { %774 = vtanh.f32 %v607_v21 }
 0xf1e   :  { %v775_v23 = vpop.eup %774 }
 0xf1f   :  { %v609_v24 = vmul.f32 %v775_v23, %v598_v42 }
 0xf21   :  { %v613_v27 = vmul.f32 %v739_v22, %v609_v24 }
 0xf23   :  { %v617_v44 = vadd.f32 %v740_v25, %v613_v27 }
 0xf25   :  { %vm618_vm5 = vcmp.ge.f32.partialorder %v617_v44, 0.0  ;;  %v619_v28 = vmul.f32 0.01, %v617_v44 }
 0xf27   :  { %v620_v29 = vsel %vm618_vm5, %v617_v44, %v619_v28 }
 0xf28   :  { %640 = vmatmul.f32.vlgmr.msra.gmra.mxu0 %v620_v29 }
 0xfa5   :  { %v641_v35 = vpop.f32.mrf.mxu0 }
 0xfa6   :  { %v642_v36 = vadd.f32 %v741_v34, %v641_v35 }
 0xfa8   :  { %vm644_vm6 = vcmp.ge.f32.partialorder %v642_v36, 0.0  ;;  %v645_v37 = vmul.f32 0.01, %v642_v36 }
 0xfaa   :  { %v646_v0 = vsel %vm644_vm6, %v642_v36, %v645_v37 }
 0xfab   :  { %733 = vmatmul.msk.f32.vlgmr.msra.gmra.mxu1 %vm650_vm7, %v646_v0 }
0x1028   :  { %v671_v19 = vpop.f32.mrf.mxu1 }
0x1029   :  { %v672_v9 = vadd.f32 %v742_v8, %v671_v19 }
0x102b   :  { %vm674_vm8 = vcmp.ge.f32.partialorder %v672_v9, 0.0  ;;  %v675_v10 = vmul.f32 0.01, %v672_v9 }
0x102d   :  { %v676_v11 = vsel %vm674_vm8, %v672_v9, %v675_v10 }
0x102e   :  { %734 = vmatmul.msk.f32.vlgmr.msrb.gmra.mxu2 %vm680_vm9, %v676_v11 }
0x10b1   :  { %v701_v13 = vpop.f32.mrf.mxu2 }
0x10b2   :  { %v702_v14 = vadd.f32 %v743_v12, %v701_v13 }
0x10b4   :  { %705 = vst.msk [vmem:[%s1308_s12] sm:$0x3] %vm704_vm10, %v702_v14 }

</bundles_post_ra>
